<compile_context>
chip_gen: v7x
topology: tpu7x:2x2x1
jax: 0.10.0
libtpu: 0.0.40
codegen_flags: <defaults>
</compile_context>

<pallas_src>
import jax
import jax.numpy as jnp
from jax.experimental import pallas as pl
from jax.experimental.pallas import tpu as pltpu

D_MODEL = 768   # fixed by nn.Linear(768, num_class)
LANE = 128
SUBLANE = 8


def _round_up(x, m):
    return (x + m - 1) // m * m


def _make_kernel(B, TB):
    """Kernel for one batch tile of TB rows.

    pos_ref : SMEM scalar-prefetch, (B_pad,) int32 -- utterance positions
    h_hbm   : HBM ref (B, S, D)  -- full hidden states (never bulk-copied)
    w_ref   : VMEM (D, C_pad)    -- classifier weight (resident across grid)
    b_ref   : VMEM (1, C_pad)    -- classifier bias
    o_ref   : VMEM (TB, C_pad)   -- logits for this batch tile
    rows    : VMEM (TB, D)       -- gathered hidden rows (scratch)
    sems    : DMA semaphores (TB,)
    """
    def kernel(pos_ref, h_hbm, w_ref, b_ref, o_ref, rows, sems):
        base = pl.program_id(0) * TB

        # Gather TB single rows H[b, utt_pos[b], :] -> rows[t, :] via DMA.
        copies = []
        for t in range(TB):
            b = jnp.minimum(base + t, B - 1)   # clamp padded tail -> valid row
            p = pos_ref[b]                     # already clamped to [0, S-1]
            cp = pltpu.make_async_copy(
                h_hbm.at[b, pl.ds(p, 1), :],   # (1, D) in HBM
                rows.at[pl.ds(t, 1), :],       # (1, D) in VMEM
                sems.at[t],
            )
            cp.start()
            copies.append(cp)
        for cp in copies:
            cp.wait()

        # One batched classifier matmul per tile: (TB, D) @ (D, C_pad).
        y = jnp.dot(rows[...], w_ref[...], preferred_element_type=jnp.float32)
        o_ref[...] = (y + b_ref[...]).astype(o_ref.dtype)

    return kernel


def context_window_forward(H, W, bias, utt_pos=None):
    """Pallas implementation of ContextWindowModel.forward.

    H       : (B, S, D) float32 -- transformer.last_hidden_state (D == 768)
    W       : (D, C)    float32 -- classifier weight (torch stores (C, D);
                                   pre-transposed here)
    bias    : (C,)      float32
    utt_pos : (B,) int32 or None (None => use position 0, i.e. H[:, 0])
    returns : (B, C)    float32
    """
    B, S, D = H.shape
    C = W.shape[1]
    assert D == D_MODEL

    if utt_pos is None:
        utt_pos = jnp.zeros((B,), dtype=jnp.int32)   # H[:, 0] path
    # Clamp: TPU ref indexing has no runtime bounds check.
    utt_pos = jnp.clip(utt_pos.astype(jnp.int32), 0, S - 1)

    TB = min(_round_up(B, SUBLANE), 128)     # batch-tile (MXU row dim)
    B_pad = _round_up(B, TB)
    C_pad = _round_up(C, LANE)               # lane-dense output / MXU cols

    pos_pad = jnp.zeros((B_pad,), jnp.int32).at[:B].set(utt_pos)
    W_pad = jnp.zeros((D, C_pad), W.dtype).at[:, :C].set(W)
    bias_pad = jnp.zeros((1, C_pad), bias.dtype).at[0, :C].set(bias)

    grid = (B_pad // TB,)
    kernel = _make_kernel(B, TB)

    grid_spec = pltpu.PrefetchScalarGridSpec(
        num_scalar_prefetch=1,               # utt_pos lands in SMEM
        grid=grid,
        in_specs=[
            pl.BlockSpec(memory_space=pl.ANY),                 # H stays in HBM
            pl.BlockSpec((D, C_pad), lambda i, pos: (0, 0)),   # W, resident
            pl.BlockSpec((1, C_pad), lambda i, pos: (0, 0)),   # bias
        ],
        out_specs=pl.BlockSpec((TB, C_pad), lambda i, pos: (i, 0)),
        scratch_shapes=[
            pltpu.VMEM((TB, D), H.dtype),        # gathered rows
            pltpu.SemaphoreType.DMA((TB,)),      # per-row DMA sems
        ],
    )

    out = pl.pallas_call(
        kernel,
        out_shape=jax.ShapeDtypeStruct((B_pad, C_pad), jnp.float32),
        grid_spec=grid_spec,
        compiler_params=pltpu.CompilerParams(
            dimension_semantics=("parallel",),   # shards tiles across TCs (v7x)
        ),
    )(pos_pad, H, W_pad, bias_pad)

    return out[:B, :C]


if __name__ == "__main__":
    # Small deterministic example shapes consistent with the module.
    B, S, D, C = 2, 8, D_MODEL, 8   # batch, seq, hidden(=768), num_class

    key = jax.random.PRNGKey(0)
    k_h, k_w, k_b, k_p = jax.random.split(key, 4)

    # TODO(synk): the wrapped `transformer` is an external black-box module;
    # its output last_hidden_state is synthesized here as the kernel input.
    H = jax.random.normal(k_h, (B, S, D), dtype=jnp.float32)
    W = 0.02 * jax.random.normal(k_w, (D, C), dtype=jnp.float32)
    bias = 0.01 * jax.random.normal(k_b, (C,), dtype=jnp.float32)
    utt_pos = jax.random.randint(k_p, (B,), 0, S, dtype=jnp.int32)

    # --- utt_pos path ---
    y = jax.block_until_ready(context_window_forward(H, W, bias, utt_pos))
    # --- utt_pos=None path (h = H[:, 0]) ---
    y_cls = jax.block_until_ready(context_window_forward(H, W, bias, None))

    # Reference check in plain JAX (highest precision matmul).
    h_g = H[jnp.arange(B), utt_pos]
    ref = jnp.dot(h_g, W, precision=jax.lax.Precision.HIGHEST) + bias
    ref_cls = jnp.dot(H[:, 0], W, precision=jax.lax.Precision.HIGHEST) + bias

    assert y.shape == (B, C) and y_cls.shape == (B, C)
    assert jnp.allclose(y, ref, atol=1e-2, rtol=1e-2), "utt_pos path mismatch"
    assert jnp.allclose(y_cls, ref_cls, atol=1e-2, rtol=1e-2), "CLS path mismatch"

    print("KERNEL_OK")
</pallas_src>

<mosaic_0001>
module attributes {stable_mosaic.version = 11 : i64} {
  func.func @kernel(%arg0: i32, %arg1: memref<8xi32, #tpu.memory_space<smem>>, %arg2: memref<2x8x768xf32, #tpu.memory_space<any>>, %arg3: memref<768x128xf32, #tpu.memory_space<vmem>>, %arg4: memref<1x128xf32, #tpu.memory_space<vmem>>, %arg5: memref<8x128xf32, #tpu.memory_space<vmem>>, %arg6: memref<8x768xf32, #tpu.memory_space<vmem>>, %arg7: memref<8x!tpu.dma_semaphore, #tpu.memory_space<semaphore_mem>>) attributes {dimension_semantics = [#tpu.dimension_semantics<parallel>], iteration_bounds = array<i64: 1>, scalar_prefetch = 1 : i64, scratch_operands = 2 : i64, tpu.core_type = #tpu.core_type<tc>, window_params = [{}, {pipeline_mode = #tpu.pipeline_mode<synchronous>, transform_indices = @transform_1, window_bounds = array<i64: 768, 128>}, {pipeline_mode = #tpu.pipeline_mode<synchronous>, transform_indices = @transform_2, window_bounds = array<i64: 1, 128>}, {transform_indices = @transform_3, window_bounds = array<i64: 8, 128>}]} {
    %c8_i32 = arith.constant 8 : i32
    %0 = arith.muli %arg0, %c8_i32 : i32
    %c0_i32 = arith.constant 0 : i32
    %1 = arith.addi %0, %c0_i32 : i32
    %c1_i32 = arith.constant 1 : i32
    %2 = arith.minsi %1, %c1_i32 : i32
    %3 = arith.index_cast %2 : i32 to index
    %4 = memref.load %arg1[%3] : memref<8xi32, #tpu.memory_space<smem>>
    %c0_i32_0 = arith.constant 0 : i32
    %c0_i32_1 = arith.constant 0 : i32
    %5 = tpu.memref_slice %arg2[%2, %4, %c0_i32_1] : memref<2x8x768xf32, #tpu.memory_space<any>> -> memref<1x1x768xf32, #tpu.memory_space<any>>
    %6 = tpu.memref_squeeze %5 : memref<1x1x768xf32, #tpu.memory_space<any>> -> memref<1x768xf32, #tpu.memory_space<any>>
    %c0_i32_2 = arith.constant 0 : i32
    %c0_i32_3 = arith.constant 0 : i32
    %7 = tpu.memref_slice %arg6[%c0_i32_2, %c0_i32_3] : memref<8x768xf32, #tpu.memory_space<vmem>> -> memref<1x768xf32, #tpu.memory_space<vmem>>
    %8 = tpu.memref_slice %arg7[%c0_i32_0] : memref<8x!tpu.dma_semaphore, #tpu.memory_space<semaphore_mem>> -> memref<1x!tpu.dma_semaphore, #tpu.memory_space<semaphore_mem>>
    %9 = tpu.memref_squeeze %8 : memref<1x!tpu.dma_semaphore, #tpu.memory_space<semaphore_mem>> -> memref<!tpu.dma_semaphore, #tpu.memory_space<semaphore_mem>>
    tpu.enqueue_dma source(%6 : memref<1x768xf32, #tpu.memory_space<any>>) target(%7 : memref<1x768xf32, #tpu.memory_space<vmem>>) target_semaphore(%9 : memref<!tpu.dma_semaphore, #tpu.memory_space<semaphore_mem>>)
    %c1_i32_4 = arith.constant 1 : i32
    %10 = arith.addi %0, %c1_i32_4 : i32
    %c1_i32_5 = arith.constant 1 : i32
    %11 = arith.minsi %10, %c1_i32_5 : i32
    %12 = arith.index_cast %11 : i32 to index
    %13 = memref.load %arg1[%12] : memref<8xi32, #tpu.memory_space<smem>>
    %c1_i32_6 = arith.constant 1 : i32
    %c0_i32_7 = arith.constant 0 : i32
    %14 = tpu.memref_slice %arg2[%11, %13, %c0_i32_7] : memref<2x8x768xf32, #tpu.memory_space<any>> -> memref<1x1x768xf32, #tpu.memory_space<any>>
    %15 = tpu.memref_squeeze %14 : memref<1x1x768xf32, #tpu.memory_space<any>> -> memref<1x768xf32, #tpu.memory_space<any>>
    %c1_i32_8 = arith.constant 1 : i32
    %c0_i32_9 = arith.constant 0 : i32
    %16 = tpu.memref_slice %arg6[%c1_i32_8, %c0_i32_9] : memref<8x768xf32, #tpu.memory_space<vmem>> -> memref<1x768xf32, #tpu.memory_space<vmem>>
    %17 = tpu.memref_slice %arg7[%c1_i32_6] : memref<8x!tpu.dma_semaphore, #tpu.memory_space<semaphore_mem>> -> memref<1x!tpu.dma_semaphore, #tpu.memory_space<semaphore_mem>>
    %18 = tpu.memref_squeeze %17 : memref<1x!tpu.dma_semaphore, #tpu.memory_space<semaphore_mem>> -> memref<!tpu.dma_semaphore, #tpu.memory_space<semaphore_mem>>
    tpu.enqueue_dma source(%15 : memref<1x768xf32, #tpu.memory_space<any>>) target(%16 : memref<1x768xf32, #tpu.memory_space<vmem>>) target_semaphore(%18 : memref<!tpu.dma_semaphore, #tpu.memory_space<semaphore_mem>>)
    %c2_i32 = arith.constant 2 : i32
    %19 = arith.addi %0, %c2_i32 : i32
    %c1_i32_10 = arith.constant 1 : i32
    %20 = arith.minsi %19, %c1_i32_10 : i32
    %21 = arith.index_cast %20 : i32 to index
    %22 = memref.load %arg1[%21] : memref<8xi32, #tpu.memory_space<smem>>
    %c2_i32_11 = arith.constant 2 : i32
    %c0_i32_12 = arith.constant 0 : i32
    %23 = tpu.memref_slice %arg2[%20, %22, %c0_i32_12] : memref<2x8x768xf32, #tpu.memory_space<any>> -> memref<1x1x768xf32, #tpu.memory_space<any>>
    %24 = tpu.memref_squeeze %23 : memref<1x1x768xf32, #tpu.memory_space<any>> -> memref<1x768xf32, #tpu.memory_space<any>>
    %c2_i32_13 = arith.constant 2 : i32
    %c0_i32_14 = arith.constant 0 : i32
    %25 = tpu.memref_slice %arg6[%c2_i32_13, %c0_i32_14] : memref<8x768xf32, #tpu.memory_space<vmem>> -> memref<1x768xf32, #tpu.memory_space<vmem>>
    %26 = tpu.memref_slice %arg7[%c2_i32_11] : memref<8x!tpu.dma_semaphore, #tpu.memory_space<semaphore_mem>> -> memref<1x!tpu.dma_semaphore, #tpu.memory_space<semaphore_mem>>
    %27 = tpu.memref_squeeze %26 : memref<1x!tpu.dma_semaphore, #tpu.memory_space<semaphore_mem>> -> memref<!tpu.dma_semaphore, #tpu.memory_space<semaphore_mem>>
    tpu.enqueue_dma source(%24 : memref<1x768xf32, #tpu.memory_space<any>>) target(%25 : memref<1x768xf32, #tpu.memory_space<vmem>>) target_semaphore(%27 : memref<!tpu.dma_semaphore, #tpu.memory_space<semaphore_mem>>)
    %c3_i32 = arith.constant 3 : i32
    %28 = arith.addi %0, %c3_i32 : i32
    %c1_i32_15 = arith.constant 1 : i32
    %29 = arith.minsi %28, %c1_i32_15 : i32
    %30 = arith.index_cast %29 : i32 to index
    %31 = memref.load %arg1[%30] : memref<8xi32, #tpu.memory_space<smem>>
    %c3_i32_16 = arith.constant 3 : i32
    %c0_i32_17 = arith.constant 0 : i32
    %32 = tpu.memref_slice %arg2[%29, %31, %c0_i32_17] : memref<2x8x768xf32, #tpu.memory_space<any>> -> memref<1x1x768xf32, #tpu.memory_space<any>>
    %33 = tpu.memref_squeeze %32 : memref<1x1x768xf32, #tpu.memory_space<any>> -> memref<1x768xf32, #tpu.memory_space<any>>
    %c3_i32_18 = arith.constant 3 : i32
    %c0_i32_19 = arith.constant 0 : i32
    %34 = tpu.memref_slice %arg6[%c3_i32_18, %c0_i32_19] : memref<8x768xf32, #tpu.memory_space<vmem>> -> memref<1x768xf32, #tpu.memory_space<vmem>>
    %35 = tpu.memref_slice %arg7[%c3_i32_16] : memref<8x!tpu.dma_semaphore, #tpu.memory_space<semaphore_mem>> -> memref<1x!tpu.dma_semaphore, #tpu.memory_space<semaphore_mem>>
    %36 = tpu.memref_squeeze %35 : memref<1x!tpu.dma_semaphore, #tpu.memory_space<semaphore_mem>> -> memref<!tpu.dma_semaphore, #tpu.memory_space<semaphore_mem>>
    tpu.enqueue_dma source(%33 : memref<1x768xf32, #tpu.memory_space<any>>) target(%34 : memref<1x768xf32, #tpu.memory_space<vmem>>) target_semaphore(%36 : memref<!tpu.dma_semaphore, #tpu.memory_space<semaphore_mem>>)
    %c4_i32 = arith.constant 4 : i32
    %37 = arith.addi %0, %c4_i32 : i32
    %c1_i32_20 = arith.constant 1 : i32
    %38 = arith.minsi %37, %c1_i32_20 : i32
    %39 = arith.index_cast %38 : i32 to index
    %40 = memref.load %arg1[%39] : memref<8xi32, #tpu.memory_space<smem>>
    %c4_i32_21 = arith.constant 4 : i32
    %c0_i32_22 = arith.constant 0 : i32
    %41 = tpu.memref_slice %arg2[%38, %40, %c0_i32_22] : memref<2x8x768xf32, #tpu.memory_space<any>> -> memref<1x1x768xf32, #tpu.memory_space<any>>
    %42 = tpu.memref_squeeze %41 : memref<1x1x768xf32, #tpu.memory_space<any>> -> memref<1x768xf32, #tpu.memory_space<any>>
    %c4_i32_23 = arith.constant 4 : i32
    %c0_i32_24 = arith.constant 0 : i32
    %43 = tpu.memref_slice %arg6[%c4_i32_23, %c0_i32_24] : memref<8x768xf32, #tpu.memory_space<vmem>> -> memref<1x768xf32, #tpu.memory_space<vmem>>
    %44 = tpu.memref_slice %arg7[%c4_i32_21] : memref<8x!tpu.dma_semaphore, #tpu.memory_space<semaphore_mem>> -> memref<1x!tpu.dma_semaphore, #tpu.memory_space<semaphore_mem>>
    %45 = tpu.memref_squeeze %44 : memref<1x!tpu.dma_semaphore, #tpu.memory_space<semaphore_mem>> -> memref<!tpu.dma_semaphore, #tpu.memory_space<semaphore_mem>>
    tpu.enqueue_dma source(%42 : memref<1x768xf32, #tpu.memory_space<any>>) target(%43 : memref<1x768xf32, #tpu.memory_space<vmem>>) target_semaphore(%45 : memref<!tpu.dma_semaphore, #tpu.memory_space<semaphore_mem>>)
    %c5_i32 = arith.constant 5 : i32
    %46 = arith.addi %0, %c5_i32 : i32
    %c1_i32_25 = arith.constant 1 : i32
    %47 = arith.minsi %46, %c1_i32_25 : i32
    %48 = arith.index_cast %47 : i32 to index
    %49 = memref.load %arg1[%48] : memref<8xi32, #tpu.memory_space<smem>>
    %c5_i32_26 = arith.constant 5 : i32
    %c0_i32_27 = arith.constant 0 : i32
    %50 = tpu.memref_slice %arg2[%47, %49, %c0_i32_27] : memref<2x8x768xf32, #tpu.memory_space<any>> -> memref<1x1x768xf32, #tpu.memory_space<any>>
    %51 = tpu.memref_squeeze %50 : memref<1x1x768xf32, #tpu.memory_space<any>> -> memref<1x768xf32, #tpu.memory_space<any>>
    %c5_i32_28 = arith.constant 5 : i32
    %c0_i32_29 = arith.constant 0 : i32
    %52 = tpu.memref_slice %arg6[%c5_i32_28, %c0_i32_29] : memref<8x768xf32, #tpu.memory_space<vmem>> -> memref<1x768xf32, #tpu.memory_space<vmem>>
    %53 = tpu.memref_slice %arg7[%c5_i32_26] : memref<8x!tpu.dma_semaphore, #tpu.memory_space<semaphore_mem>> -> memref<1x!tpu.dma_semaphore, #tpu.memory_space<semaphore_mem>>
    %54 = tpu.memref_squeeze %53 : memref<1x!tpu.dma_semaphore, #tpu.memory_space<semaphore_mem>> -> memref<!tpu.dma_semaphore, #tpu.memory_space<semaphore_mem>>
    tpu.enqueue_dma source(%51 : memref<1x768xf32, #tpu.memory_space<any>>) target(%52 : memref<1x768xf32, #tpu.memory_space<vmem>>) target_semaphore(%54 : memref<!tpu.dma_semaphore, #tpu.memory_space<semaphore_mem>>)
    %c6_i32 = arith.constant 6 : i32
    %55 = arith.addi %0, %c6_i32 : i32
    %c1_i32_30 = arith.constant 1 : i32
    %56 = arith.minsi %55, %c1_i32_30 : i32
    %57 = arith.index_cast %56 : i32 to index
    %58 = memref.load %arg1[%57] : memref<8xi32, #tpu.memory_space<smem>>
    %c6_i32_31 = arith.constant 6 : i32
    %c0_i32_32 = arith.constant 0 : i32
    %59 = tpu.memref_slice %arg2[%56, %58, %c0_i32_32] : memref<2x8x768xf32, #tpu.memory_space<any>> -> memref<1x1x768xf32, #tpu.memory_space<any>>
    %60 = tpu.memref_squeeze %59 : memref<1x1x768xf32, #tpu.memory_space<any>> -> memref<1x768xf32, #tpu.memory_space<any>>
    %c6_i32_33 = arith.constant 6 : i32
    %c0_i32_34 = arith.constant 0 : i32
    %61 = tpu.memref_slice %arg6[%c6_i32_33, %c0_i32_34] : memref<8x768xf32, #tpu.memory_space<vmem>> -> memref<1x768xf32, #tpu.memory_space<vmem>>
    %62 = tpu.memref_slice %arg7[%c6_i32_31] : memref<8x!tpu.dma_semaphore, #tpu.memory_space<semaphore_mem>> -> memref<1x!tpu.dma_semaphore, #tpu.memory_space<semaphore_mem>>
    %63 = tpu.memref_squeeze %62 : memref<1x!tpu.dma_semaphore, #tpu.memory_space<semaphore_mem>> -> memref<!tpu.dma_semaphore, #tpu.memory_space<semaphore_mem>>
    tpu.enqueue_dma source(%60 : memref<1x768xf32, #tpu.memory_space<any>>) target(%61 : memref<1x768xf32, #tpu.memory_space<vmem>>) target_semaphore(%63 : memref<!tpu.dma_semaphore, #tpu.memory_space<semaphore_mem>>)
    %c7_i32 = arith.constant 7 : i32
    %64 = arith.addi %0, %c7_i32 : i32
    %c1_i32_35 = arith.constant 1 : i32
    %65 = arith.minsi %64, %c1_i32_35 : i32
    %66 = arith.index_cast %65 : i32 to index
    %67 = memref.load %arg1[%66] : memref<8xi32, #tpu.memory_space<smem>>
    %c7_i32_36 = arith.constant 7 : i32
    %c0_i32_37 = arith.constant 0 : i32
    %68 = tpu.memref_slice %arg2[%65, %67, %c0_i32_37] : memref<2x8x768xf32, #tpu.memory_space<any>> -> memref<1x1x768xf32, #tpu.memory_space<any>>
    %69 = tpu.memref_squeeze %68 : memref<1x1x768xf32, #tpu.memory_space<any>> -> memref<1x768xf32, #tpu.memory_space<any>>
    %c7_i32_38 = arith.constant 7 : i32
    %c0_i32_39 = arith.constant 0 : i32
    %70 = tpu.memref_slice %arg6[%c7_i32_38, %c0_i32_39] : memref<8x768xf32, #tpu.memory_space<vmem>> -> memref<1x768xf32, #tpu.memory_space<vmem>>
    %71 = tpu.memref_slice %arg7[%c7_i32_36] : memref<8x!tpu.dma_semaphore, #tpu.memory_space<semaphore_mem>> -> memref<1x!tpu.dma_semaphore, #tpu.memory_space<semaphore_mem>>
    %72 = tpu.memref_squeeze %71 : memref<1x!tpu.dma_semaphore, #tpu.memory_space<semaphore_mem>> -> memref<!tpu.dma_semaphore, #tpu.memory_space<semaphore_mem>>
    tpu.enqueue_dma source(%69 : memref<1x768xf32, #tpu.memory_space<any>>) target(%70 : memref<1x768xf32, #tpu.memory_space<vmem>>) target_semaphore(%72 : memref<!tpu.dma_semaphore, #tpu.memory_space<semaphore_mem>>)
    %c0_i32_40 = arith.constant 0 : i32
    %c0_i32_41 = arith.constant 0 : i32
    %73 = tpu.memref_slice %arg2[%2, %4, %c0_i32_41] : memref<2x8x768xf32, #tpu.memory_space<any>> -> memref<1x1x768xf32, #tpu.memory_space<any>>
    %74 = tpu.memref_squeeze %73 : memref<1x1x768xf32, #tpu.memory_space<any>> -> memref<1x768xf32, #tpu.memory_space<any>>
    %c0_i32_42 = arith.constant 0 : i32
    %c0_i32_43 = arith.constant 0 : i32
    %75 = tpu.memref_slice %arg6[%c0_i32_42, %c0_i32_43] : memref<8x768xf32, #tpu.memory_space<vmem>> -> memref<1x768xf32, #tpu.memory_space<vmem>>
    %76 = tpu.memref_slice %arg7[%c0_i32_40] : memref<8x!tpu.dma_semaphore, #tpu.memory_space<semaphore_mem>> -> memref<1x!tpu.dma_semaphore, #tpu.memory_space<semaphore_mem>>
    %77 = tpu.memref_squeeze %76 : memref<1x!tpu.dma_semaphore, #tpu.memory_space<semaphore_mem>> -> memref<!tpu.dma_semaphore, #tpu.memory_space<semaphore_mem>>
    tpu.wait_dma2 semaphore(%77 : memref<!tpu.dma_semaphore, #tpu.memory_space<semaphore_mem>>) src(%74 : memref<1x768xf32, #tpu.memory_space<any>>) dst(%75 : memref<1x768xf32, #tpu.memory_space<vmem>>)
    %c1_i32_44 = arith.constant 1 : i32
    %c0_i32_45 = arith.constant 0 : i32
    %78 = tpu.memref_slice %arg2[%11, %13, %c0_i32_45] : memref<2x8x768xf32, #tpu.memory_space<any>> -> memref<1x1x768xf32, #tpu.memory_space<any>>
    %79 = tpu.memref_squeeze %78 : memref<1x1x768xf32, #tpu.memory_space<any>> -> memref<1x768xf32, #tpu.memory_space<any>>
    %c1_i32_46 = arith.constant 1 : i32
    %c0_i32_47 = arith.constant 0 : i32
    %80 = tpu.memref_slice %arg6[%c1_i32_46, %c0_i32_47] : memref<8x768xf32, #tpu.memory_space<vmem>> -> memref<1x768xf32, #tpu.memory_space<vmem>>
    %81 = tpu.memref_slice %arg7[%c1_i32_44] : memref<8x!tpu.dma_semaphore, #tpu.memory_space<semaphore_mem>> -> memref<1x!tpu.dma_semaphore, #tpu.memory_space<semaphore_mem>>
    %82 = tpu.memref_squeeze %81 : memref<1x!tpu.dma_semaphore, #tpu.memory_space<semaphore_mem>> -> memref<!tpu.dma_semaphore, #tpu.memory_space<semaphore_mem>>
    tpu.wait_dma2 semaphore(%82 : memref<!tpu.dma_semaphore, #tpu.memory_space<semaphore_mem>>) src(%79 : memref<1x768xf32, #tpu.memory_space<any>>) dst(%80 : memref<1x768xf32, #tpu.memory_space<vmem>>)
    %c2_i32_48 = arith.constant 2 : i32
    %c0_i32_49 = arith.constant 0 : i32
    %83 = tpu.memref_slice %arg2[%20, %22, %c0_i32_49] : memref<2x8x768xf32, #tpu.memory_space<any>> -> memref<1x1x768xf32, #tpu.memory_space<any>>
    %84 = tpu.memref_squeeze %83 : memref<1x1x768xf32, #tpu.memory_space<any>> -> memref<1x768xf32, #tpu.memory_space<any>>
    %c2_i32_50 = arith.constant 2 : i32
    %c0_i32_51 = arith.constant 0 : i32
    %85 = tpu.memref_slice %arg6[%c2_i32_50, %c0_i32_51] : memref<8x768xf32, #tpu.memory_space<vmem>> -> memref<1x768xf32, #tpu.memory_space<vmem>>
    %86 = tpu.memref_slice %arg7[%c2_i32_48] : memref<8x!tpu.dma_semaphore, #tpu.memory_space<semaphore_mem>> -> memref<1x!tpu.dma_semaphore, #tpu.memory_space<semaphore_mem>>
    %87 = tpu.memref_squeeze %86 : memref<1x!tpu.dma_semaphore, #tpu.memory_space<semaphore_mem>> -> memref<!tpu.dma_semaphore, #tpu.memory_space<semaphore_mem>>
    tpu.wait_dma2 semaphore(%87 : memref<!tpu.dma_semaphore, #tpu.memory_space<semaphore_mem>>) src(%84 : memref<1x768xf32, #tpu.memory_space<any>>) dst(%85 : memref<1x768xf32, #tpu.memory_space<vmem>>)
    %c3_i32_52 = arith.constant 3 : i32
    %c0_i32_53 = arith.constant 0 : i32
    %88 = tpu.memref_slice %arg2[%29, %31, %c0_i32_53] : memref<2x8x768xf32, #tpu.memory_space<any>> -> memref<1x1x768xf32, #tpu.memory_space<any>>
    %89 = tpu.memref_squeeze %88 : memref<1x1x768xf32, #tpu.memory_space<any>> -> memref<1x768xf32, #tpu.memory_space<any>>
    %c3_i32_54 = arith.constant 3 : i32
    %c0_i32_55 = arith.constant 0 : i32
    %90 = tpu.memref_slice %arg6[%c3_i32_54, %c0_i32_55] : memref<8x768xf32, #tpu.memory_space<vmem>> -> memref<1x768xf32, #tpu.memory_space<vmem>>
    %91 = tpu.memref_slice %arg7[%c3_i32_52] : memref<8x!tpu.dma_semaphore, #tpu.memory_space<semaphore_mem>> -> memref<1x!tpu.dma_semaphore, #tpu.memory_space<semaphore_mem>>
    %92 = tpu.memref_squeeze %91 : memref<1x!tpu.dma_semaphore, #tpu.memory_space<semaphore_mem>> -> memref<!tpu.dma_semaphore, #tpu.memory_space<semaphore_mem>>
    tpu.wait_dma2 semaphore(%92 : memref<!tpu.dma_semaphore, #tpu.memory_space<semaphore_mem>>) src(%89 : memref<1x768xf32, #tpu.memory_space<any>>) dst(%90 : memref<1x768xf32, #tpu.memory_space<vmem>>)
    %c4_i32_56 = arith.constant 4 : i32
    %c0_i32_57 = arith.constant 0 : i32
    %93 = tpu.memref_slice %arg2[%38, %40, %c0_i32_57] : memref<2x8x768xf32, #tpu.memory_space<any>> -> memref<1x1x768xf32, #tpu.memory_space<any>>
    %94 = tpu.memref_squeeze %93 : memref<1x1x768xf32, #tpu.memory_space<any>> -> memref<1x768xf32, #tpu.memory_space<any>>
    %c4_i32_58 = arith.constant 4 : i32
    %c0_i32_59 = arith.constant 0 : i32
    %95 = tpu.memref_slice %arg6[%c4_i32_58, %c0_i32_59] : memref<8x768xf32, #tpu.memory_space<vmem>> -> memref<1x768xf32, #tpu.memory_space<vmem>>
    %96 = tpu.memref_slice %arg7[%c4_i32_56] : memref<8x!tpu.dma_semaphore, #tpu.memory_space<semaphore_mem>> -> memref<1x!tpu.dma_semaphore, #tpu.memory_space<semaphore_mem>>
    %97 = tpu.memref_squeeze %96 : memref<1x!tpu.dma_semaphore, #tpu.memory_space<semaphore_mem>> -> memref<!tpu.dma_semaphore, #tpu.memory_space<semaphore_mem>>
    tpu.wait_dma2 semaphore(%97 : memref<!tpu.dma_semaphore, #tpu.memory_space<semaphore_mem>>) src(%94 : memref<1x768xf32, #tpu.memory_space<any>>) dst(%95 : memref<1x768xf32, #tpu.memory_space<vmem>>)
    %c5_i32_60 = arith.constant 5 : i32
    %c0_i32_61 = arith.constant 0 : i32
    %98 = tpu.memref_slice %arg2[%47, %49, %c0_i32_61] : memref<2x8x768xf32, #tpu.memory_space<any>> -> memref<1x1x768xf32, #tpu.memory_space<any>>
    %99 = tpu.memref_squeeze %98 : memref<1x1x768xf32, #tpu.memory_space<any>> -> memref<1x768xf32, #tpu.memory_space<any>>
    %c5_i32_62 = arith.constant 5 : i32
    %c0_i32_63 = arith.constant 0 : i32
    %100 = tpu.memref_slice %arg6[%c5_i32_62, %c0_i32_63] : memref<8x768xf32, #tpu.memory_space<vmem>> -> memref<1x768xf32, #tpu.memory_space<vmem>>
    %101 = tpu.memref_slice %arg7[%c5_i32_60] : memref<8x!tpu.dma_semaphore, #tpu.memory_space<semaphore_mem>> -> memref<1x!tpu.dma_semaphore, #tpu.memory_space<semaphore_mem>>
    %102 = tpu.memref_squeeze %101 : memref<1x!tpu.dma_semaphore, #tpu.memory_space<semaphore_mem>> -> memref<!tpu.dma_semaphore, #tpu.memory_space<semaphore_mem>>
    tpu.wait_dma2 semaphore(%102 : memref<!tpu.dma_semaphore, #tpu.memory_space<semaphore_mem>>) src(%99 : memref<1x768xf32, #tpu.memory_space<any>>) dst(%100 : memref<1x768xf32, #tpu.memory_space<vmem>>)
    %c6_i32_64 = arith.constant 6 : i32
    %c0_i32_65 = arith.constant 0 : i32
    %103 = tpu.memref_slice %arg2[%56, %58, %c0_i32_65] : memref<2x8x768xf32, #tpu.memory_space<any>> -> memref<1x1x768xf32, #tpu.memory_space<any>>
    %104 = tpu.memref_squeeze %103 : memref<1x1x768xf32, #tpu.memory_space<any>> -> memref<1x768xf32, #tpu.memory_space<any>>
    %c6_i32_66 = arith.constant 6 : i32
    %c0_i32_67 = arith.constant 0 : i32
    %105 = tpu.memref_slice %arg6[%c6_i32_66, %c0_i32_67] : memref<8x768xf32, #tpu.memory_space<vmem>> -> memref<1x768xf32, #tpu.memory_space<vmem>>
    %106 = tpu.memref_slice %arg7[%c6_i32_64] : memref<8x!tpu.dma_semaphore, #tpu.memory_space<semaphore_mem>> -> memref<1x!tpu.dma_semaphore, #tpu.memory_space<semaphore_mem>>
    %107 = tpu.memref_squeeze %106 : memref<1x!tpu.dma_semaphore, #tpu.memory_space<semaphore_mem>> -> memref<!tpu.dma_semaphore, #tpu.memory_space<semaphore_mem>>
    tpu.wait_dma2 semaphore(%107 : memref<!tpu.dma_semaphore, #tpu.memory_space<semaphore_mem>>) src(%104 : memref<1x768xf32, #tpu.memory_space<any>>) dst(%105 : memref<1x768xf32, #tpu.memory_space<vmem>>)
    %c7_i32_68 = arith.constant 7 : i32
    %c0_i32_69 = arith.constant 0 : i32
    %108 = tpu.memref_slice %arg2[%65, %67, %c0_i32_69] : memref<2x8x768xf32, #tpu.memory_space<any>> -> memref<1x1x768xf32, #tpu.memory_space<any>>
    %109 = tpu.memref_squeeze %108 : memref<1x1x768xf32, #tpu.memory_space<any>> -> memref<1x768xf32, #tpu.memory_space<any>>
    %c7_i32_70 = arith.constant 7 : i32
    %c0_i32_71 = arith.constant 0 : i32
    %110 = tpu.memref_slice %arg6[%c7_i32_70, %c0_i32_71] : memref<8x768xf32, #tpu.memory_space<vmem>> -> memref<1x768xf32, #tpu.memory_space<vmem>>
    %111 = tpu.memref_slice %arg7[%c7_i32_68] : memref<8x!tpu.dma_semaphore, #tpu.memory_space<semaphore_mem>> -> memref<1x!tpu.dma_semaphore, #tpu.memory_space<semaphore_mem>>
    %112 = tpu.memref_squeeze %111 : memref<1x!tpu.dma_semaphore, #tpu.memory_space<semaphore_mem>> -> memref<!tpu.dma_semaphore, #tpu.memory_space<semaphore_mem>>
    tpu.wait_dma2 semaphore(%112 : memref<!tpu.dma_semaphore, #tpu.memory_space<semaphore_mem>>) src(%109 : memref<1x768xf32, #tpu.memory_space<any>>) dst(%110 : memref<1x768xf32, #tpu.memory_space<vmem>>)
    %c0 = arith.constant 0 : index
    %c0_72 = arith.constant 0 : index
    %113 = vector.load %arg6[%c0, %c0_72] : memref<8x768xf32, #tpu.memory_space<vmem>>, vector<8x768xf32>
    %c0_73 = arith.constant 0 : index
    %c0_74 = arith.constant 0 : index
    %114 = vector.load %arg3[%c0_73, %c0_74] : memref<768x128xf32, #tpu.memory_space<vmem>>, vector<768x128xf32>
    %cst = arith.constant dense<0.000000e+00> : vector<8x128xf32>
    %115 = tpu.matmul %113, %114, %cst {dimension_numbers = #tpu.dot_dimension_numbers<[1], [0], [0], [1], [0, 0, 1, 1], [], []>} : vector<8x768xf32>, vector<768x128xf32>, vector<8x128xf32> -> vector<8x128xf32>
    %c0_75 = arith.constant 0 : index
    %c0_76 = arith.constant 0 : index
    %116 = vector.load %arg4[%c0_75, %c0_76] : memref<1x128xf32, #tpu.memory_space<vmem>>, vector<1x128xf32>
    %117 = vector.broadcast %116 : vector<1x128xf32> to vector<8x128xf32>
    %118 = arith.addf %115, %117 : vector<8x128xf32>
    %c0_77 = arith.constant 0 : index
    %c0_78 = arith.constant 0 : index
    %119 = vector.load %arg5[%c0_77, %c0_78] : memref<8x128xf32, #tpu.memory_space<vmem>>, vector<8x128xf32>
    tpu.vector_store %arg5[%c0_77, %c0_78], %118 {strides = array<i32>} : memref<8x128xf32, #tpu.memory_space<vmem>>, vector<8x128xf32>,
    return
  }
  func.func @transform_1(%arg0: i32, %arg1: memref<8xi32, #tpu.memory_space<smem>>) -> (i32, i32) {
    %c0_i32 = arith.constant 0 : i32
    %c0_i32_0 = arith.constant 0 : i32
    %c0_i32_1 = arith.constant 0 : i32
    return %c0_i32, %c0_i32_0 : i32, i32
  }
  func.func @transform_2(%arg0: i32, %arg1: memref<8xi32, #tpu.memory_space<smem>>) -> (i32, i32) {
    %c0_i32 = arith.constant 0 : i32
    %c0_i32_0 = arith.constant 0 : i32
    %c0_i32_1 = arith.constant 0 : i32
    return %c0_i32, %c0_i32_0 : i32, i32
  }
  func.func @transform_3(%arg0: i32, %arg1: memref<8xi32, #tpu.memory_space<smem>>) -> (i32, i32) {
    %c0_i32 = arith.constant 0 : i32
    %c0_i32_0 = arith.constant 0 : i32
    return %arg0, %c0_i32 : i32, i32
  }
}

</mosaic_0001>

<bundles_post_ra>
// kernel: tpu_custom_call.1
= control target key start
LH: loop header
LB: loop body
LE: loop exit
PB: predicated region body
PF: predicated region fallthrough
CT: control target
= control target key end

     0   :  { %s1354_s0 = inlined_call_operand.hbm [shape: s32[8], index: 0, kind: input, shape index: {}]   ;;  %s1355_s1 = inlined_call_operand.hbm [shape: f32[2,8,768], index: 1, kind: input, shape index: {}]   ;;  %s1356_s2 = inlined_call_operand.hbm [shape: f32[768,128], index: 2, kind: input, shape index: {}]   ;;  %s1357_s3 = inlined_call_operand.vmem [shape: f32[1,128], index: 3, kind: input, shape index: {}]   ;;  %s1358_s4 = inlined_call_operand.hbm [shape: f32[8,128], index: 4, kind: output, shape index: {}]  }
   0x1   :  { %s890_s17 = scalar_lea.hbm %s1354_s0, 16 }
   0x2   :  { %p891_p0 = scmp.ne.s32.totalorder %s1354_s0, %s890_s17  ;;  %p894_p1 = scmp.lt.u32.totalorder %s890_s17, %s1354_s0 }
   0x4   :  { %p896_p2 = pnand %p894_p1, %p891_p0 }
   0x6   :  { %899 = shalt.err (!%p896_p2)  }
   0x7   :  { %s1158_s22 = smov [#allocation5]  }
   0x8   :  { %10 = dma.hbm_to_smem %s1354_s0, 16, %s1158_s22, [#allocation4] }
   0x9   :  { %1136 = dma.done.wait [#allocation4], 16 }
   0xa   :  { %1137 = vsyncadd [#allocation4], 4294967280 }
   0xb   :  { %12 = sfence }
   0xc   :  { %13 = vsyncpa [#allocation7], 0 }
   0xd   :  { %14 = vsyncpa [#allocation8], 0  ;;  %s1159_s25 = smov [#allocation6]   ;;  %s900_s29 = scalar_lea.hbm %s1356_s2, 12288 }
   0xe   :  { %s20_s26 = sshll.u32 %s1159_s25, 4  ;;  %p901_p3 = scmp.ne.s32.totalorder %s1356_s2, %s900_s29  ;;  %s21_s26 = int_to_ptr.vmem [resolvable:$true] %s20_s26 }
   0xf   :  { %p904_p4 = scmp.lt.u32.totalorder %s900_s29, %s1356_s2 }
  0x11   :  { %p906_p5 = pnand %p904_p4, %p901_p3 }
  0x13   :  { %909 = shalt.err (!%p906_p5)
}
  0x14   :  { %s910_s0 = scalar_lea.vmem %s21_s26, 12288  ;;  %p915_p7 = scmp.lt.s32.totalorder %s21_s26, %s21_s26 }
  0x15   :  { %p911_p6 = scmp.ne.s32.totalorder %s21_s26, %s910_s0  ;;  %p916_p8 = scmp.lt.s32.totalorder %s910_s0, %s910_s0 }
  0x17   :  { %p917_p9 = por %p916_p8, %p915_p7 }
  0x19   :  { %p918_p10 = pnand %p917_p9, %p911_p6 }
  0x1b   :  { %921 = shalt.err (!%p918_p10)
}
  0x1c   :  { %s1160_s8 = smov 128   ;;  %s1161_s9 = smov 8  }
  0x1d   :  { %26 = dma.hbm_to_vmem [thread:$0]  %s1356_s2, 12288, %s21_s26, [#allocation7], %s1160_s8, %s1160_s8, %s1161_s9  }
  0x1e   :  { %1138 = dma.done.wait [#allocation7], 12288  }
  0x1f   :  { %1139 = vsyncadd [#allocation7], 4294955008  ;;  %s35_s12 = sld [smem:[#allocation5]]  ;;  %s1162_s13 = smov [#allocation2]  }
  0x20   :  { %s45_s14 = sshll.u32 %s1162_s13, 4  ;;  %s638_s15 = sld [smem:[#allocation5 + $0x1]]  ;;  %s1223_s14 = int_to_ptr.vmem [resolvable:$true] %s45_s14 }
  0x21   :  { %s1163_s16 = smov [#allocation2 + $0x1]   ;;  %s1164_s18 = smov [#allocation2 + $0x2]  }
  0x22   :  { %s64_s17 = sshll.u32 %s1163_s16, 4  ;;  %s83_s19 = sshll.u32 %s1164_s18, 4  ;;  %s1225_s17 = int_to_ptr.vmem [resolvable:$true] %s64_s17  ;;  %s1227_s19 = int_to_ptr.vmem [resolvable:$true] %s83_s19 }
  0x23   :  { %s1165_s26 = smov [#allocation2 + $0x3]   ;;  %s924_s11 = scalar_lea.hbm %s1355_s1, 1536 }
  0x24   :  { %s102_s27 = sshll.u32 %s1165_s26, 4  ;;  %s1250_s27 = int_to_ptr.vmem [resolvable:$true] %s102_s27 }
  0x25   :  { %s36_s20 = sshrl.u32 %s35_s12, 3  ;;  %s37_s21 = sand.u32 7, %s35_s12  }
  0x26   :  { %s38_s22 = smul.u32 48, %s36_s20  ;;  %s53_s2 = sshrl.u32 %s638_s15, 3 }
  0x27   :  { %s54_s23 = sand.u32 7, %s638_s15   ;;  %s55_s24 = smul.u32 48, %s53_s2 }
  0x28   :  { %s39_s25 = sadd.s32 %s38_s22, %s37_s21 }
  0x29   :  { %s637_s28 = sshll.u32 %s39_s25, 4  ;;  %s56_s29 = sadd.s32 %s55_s24, %s54_s23 }
  0x2a   :  { %s43_s6 = scalar_lea.hbm %s1355_s1, %s637_s28  ;;  %s661_s7 = sshll.u32 %s56_s29, 4 }
  0x2b   :  { %s922_s0 = scalar_lea.hbm %s43_s6, 96  ;;  %p925_p12 = scmp.lt.u32.totalorder %s43_s6, %s1355_s1 }
  0x2c   :  { %p923_p11 = scmp.ne.s32.totalorder %s43_s6, %s922_s0  ;;  %p926_p13 = scmp.lt.u32.totalorder %s924_s11, %s922_s0 }
  0x2d   :  { %p928_p1 = scmp.lt.u32.totalorder %s922_s0, %s43_s6 }
  0x2e   :  { %p927_p0 = por %p926_p13, %p925_p12 }
  0x30   :  { %p929_p2 = por %p928_p1, %p927_p0 }
  0x32   :  { %p930_p3 = pnand %p929_p2, %p923_p11 }
  0x34   :  { %933 = shalt.err (!%p930_p3)  }
  0x35   :  { %s934_s15 = scalar_lea.vmem %s1223_s14, 96  ;;  %s1241_s16 = scalar_lea.vmem %s1223_s14, 768 }
  0x36   :  { %p935_p4 = scmp.ne.s32.totalorder %s1223_s14, %s934_s15  ;;  %p939_p5 = scmp.lt.s32.totalorder %s1223_s14, %s1223_s14 }
  0x37   :  { %p940_p6 = scmp.lt.s32.totalorder %s1241_s16, %s934_s15 }
  0x39   :  { %p941_p7 = por %p940_p6, %p939_p5 }
  0x3b   :  { %p942_p8 = pnand %p941_p7, %p935_p4 }
  0x3d   :  { %945 = shalt.err (!%p942_p8)  }
  0x3e   :  { %s1166_s18 = smov 1   ;;  %s662_s20 = sadd.s32 768, %s661_s7 }
  0x3f   :  { %48 = dma.hbm_to_vmem [thread:$0]  %s43_s6, 96, %s1223_s14, [#allocation3], %s1160_s8, %s1160_s8, %s1166_s18 }
  0x40   :  { %s1255_s2 = scalar_lea.hbm %s1355_s1, %s662_s20  ;;  %s1167_s23 = smov [#allocation2 + $0x4]  }
  0x41   :  { %s1257_s24 = sshll.u32 %s1167_s23, 4  ;;  %s946_s25 = scalar_lea.hbm %s1255_s2, 96  ;;  %s122_s24 = int_to_ptr.vmem [resolvable:$true] %s1257_s24 }
  0x42   :  { %p947_p9 = scmp.ne.s32.totalorder %s1255_s2, %s946_s25  ;;  %p949_p10 = scmp.lt.u32.totalorder %s1255_s2, %s1355_s1 }
  0x43   :  { %p950_p11 = scmp.lt.u32.totalorder %s924_s11, %s946_s25  ;;  %p952_p13 = scmp.lt.u32.totalorder %s946_s25, %s1255_s2 }
  0x45   :  { %p951_p12 = por %p950_p11, %p949_p10 }
  0x47   :  { %p953_p0 = por %p952_p13, %p951_p12 }
  0x49   :  { %p1266_p1 = pnand %p953_p0, %p947_p9 }
  0x4b   :  { %957 = shalt.err (!%p1266_p1)  }
  0x4c   :  { %s958_s30 = scalar_lea.vmem %s1225_s17, 96  ;;  %p963_p3 = scmp.lt.s32.totalorder %s1225_s17, %s1223_s14 }
  0x4d   :  { %p959_p2 = scmp.ne.s32.totalorder %s1225_s17, %s958_s30  ;;  %p964_p4 = scmp.lt.s32.totalorder %s1241_s16, %s958_s30 }
  0x4f   :  { %p965_p5 = por %p964_p4, %p963_p3 }
  0x51   :  { %p966_p6 = pnand %p965_p5, %p959_p2 }
  0x53   :  { %969 = shalt.err (!%p966_p6)  }
  0x54   :  { %67 = dma.hbm_to_vmem [thread:$0]  %s1255_s2, 96, %s1225_s17, [#allocation3 + $0x1], %s1160_s8, %s1160_s8, %s1166_s18 }
  0x55   :  { %981 = shalt.err (!%p1266_p1)  }
  0x56   :  { %s982_s1 = scalar_lea.vmem %s1227_s19, 96  ;;  %p987_p8 = scmp.lt.s32.totalorder %s1227_s19, %s1223_s14 }
  0x57   :  { %p983_p7 = scmp.ne.s32.totalorder %s1227_s19, %s982_s1  ;;  %p988_p9 = scmp.lt.s32.totalorder %s1241_s16, %s982_s1 }
  0x59   :  { %p989_p10 = por %p988_p9, %p987_p8 }
  0x5b   :  { %p990_p11 = pnand %p989_p10, %p983_p7 }
  0x5d   :  { %993 = shalt.err (!%p990_p11)  }
  0x5e   :  { %86 = dma.hbm_to_vmem [thread:$0]  %s1255_s2, 96, %s1227_s19, [#allocation3 + $0x2], %s1160_s8, %s1160_s8, %s1166_s18 }
  0x5f   :  { %1005 = shalt.err (!%p1266_p1)  }
  0x60   :  { %s1006_s17 = scalar_lea.vmem %s1250_s27, 96  ;;  %p1011_p13 = scmp.lt.s32.totalorder %s1250_s27, %s1223_s14 }
  0x61   :  { %p1007_p12 = scmp.ne.s32.totalorder %s1250_s27, %s1006_s17  ;;  %p1012_p0 = scmp.lt.s32.totalorder %s1241_s16, %s1006_s17 }
  0x63   :  { %p1013_p2 = por %p1012_p0, %p1011_p13 }
  0x65   :  { %p1014_p3 = pnand %p1013_p2, %p1007_p12 }
  0x67   :  { %1017 = shalt.err (!%p1014_p3)  }
  0x68   :  { %105 = dma.hbm_to_vmem [thread:$0]  %s1255_s2, 96, %s1250_s27, [#allocation3 + $0x3], %s1160_s8, %s1160_s8, %s1166_s18 }
  0x69   :  { %1029 = shalt.err (!%p1266_p1)  }
  0x6a   :  { %s1030_s19 = scalar_lea.vmem %s122_s24, 96  ;;  %p1035_p5 = scmp.lt.s32.totalorder %s122_s24, %s1223_s14 }
  0x6b   :  { %p1031_p4 = scmp.ne.s32.totalorder %s122_s24, %s1030_s19  ;;  %p1036_p6 = scmp.lt.s32.totalorder %s1241_s16, %s1030_s19 }
  0x6d   :  { %p1037_p7 = por %p1036_p6, %p1035_p5 }
  0x6f   :  { %p1038_p8 = pnand %p1037_p7, %p1031_p4 }
  0x71   :  { %1041 = shalt.err (!%p1038_p8)  }
  0x72   :  { %124 = dma.hbm_to_vmem [thread:$0]  %s1255_s2, 96, %s122_s24, [#allocation3 + $0x4], %s1160_s8, %s1160_s8, %s1166_s18 }
  0x73   :  { %s1168_s5 = smov [#allocation2 + $0x5]   ;;  %s1169_s6 = smov [#allocation2 + $0x6]  }
  0x74   :  { %s140_s27 = sshll.u32 %s1168_s5, 4  ;;  %s159_s7 = sshll.u32 %s1169_s6, 4  ;;  %s141_s27 = int_to_ptr.vmem [resolvable:$true] %s140_s27  ;;  %s160_s7 = int_to_ptr.vmem [resolvable:$true] %s159_s7 }
  0x75   :  { %1053 = shalt.err (!%p1266_p1)  }
  0x76   :  { %s1054_s0 = scalar_lea.vmem %s141_s27, 96  ;;  %p1059_p10 = scmp.lt.s32.totalorder %s141_s27, %s1223_s14 }
  0x77   :  { %p1055_p9 = scmp.ne.s32.totalorder %s141_s27, %s1054_s0  ;;  %p1060_p11 = scmp.lt.s32.totalorder %s1241_s16, %s1054_s0 }
  0x79   :  { %p1061_p12 = por %p1060_p11, %p1059_p10 }
  0x7b   :  { %p1062_p13 = pnand %p1061_p12, %p1055_p9 }
  0x7d   :  { %1065 = shalt.err (!%p1062_p13)  }
  0x7e   :  { %143 = dma.hbm_to_vmem [thread:$0]  %s1255_s2, 96, %s141_s27, [#allocation3 + $0x5], %s1160_s8, %s1160_s8, %s1166_s18 }
  0x7f   :  { %1077 = shalt.err (!%p1266_p1)  }
  0x80   :  { %s1078_s9 = scalar_lea.vmem %s160_s7, 96  ;;  %p1083_p2 = scmp.lt.s32.totalorder %s160_s7, %s1223_s14 }
  0x81   :  { %p1079_p0 = scmp.ne.s32.totalorder %s160_s7, %s1078_s9  ;;  %p1084_p3 = scmp.lt.s32.totalorder %s1241_s16, %s1078_s9 }
  0x83   :  { %p1085_p4 = por %p1084_p3, %p1083_p2 }
  0x85   :  { %p1086_p5 = pnand %p1085_p4, %p1079_p0 }
  0x87   :  { %1089 = shalt.err (!%p1086_p5)  }
  0x88   :  { %162 = dma.hbm_to_vmem [thread:$0]  %s1255_s2, 96, %s160_s7, [#allocation3 + $0x6], %s1160_s8, %s1160_s8, %s1166_s18 }
  0x89   :  { %s1170_s10 = smov [#allocation2 + $0x7]  }
  0x8a   :  { %s178_s11 = sshll.u32 %s1170_s10, 4  ;;  %s179_s11 = int_to_ptr.vmem [resolvable:$true] %s178_s11 }
  0x8b   :  { %1101 = shalt.err (!%p1266_p1)  }
  0x8c   :  { %s1102_s12 = scalar_lea.vmem %s179_s11, 96  ;;  %p1107_p7 = scmp.lt.s32.totalorder %s179_s11, %s1223_s14 }
  0x8d   :  { %p1103_p6 = scmp.ne.s32.totalorder %s179_s11, %s1102_s12  ;;  %p1108_p8 = scmp.lt.s32.totalorder %s1241_s16, %s1102_s12 }
  0x8f   :  { %p1109_p9 = por %p1108_p8, %p1107_p7 }
  0x91   :  { %p1110_p10 = pnand %p1109_p9, %p1103_p6 }
  0x93   :  { %1113 = shalt.err (!%p1110_p10)  }
  0x94   :  { %181 = dma.hbm_to_vmem [thread:$0]  %s1255_s2, 96, %s179_s11, [#allocation3 + $0x7], %s1160_s8, %s1160_s8, %s1166_s18 }
  0x95   :  { %1140 = dma.done.wait [#allocation3], 96 }
  0x96   :  { %1141 = vsyncadd [#allocation3], 4294967200 }
  0x97   :  { %1142 = dma.done.wait [#allocation3 + $0x1], 96 }
  0x98   :  { %1143 = vsyncadd [#allocation3 + $0x1], 4294967200 }
  0x99   :  { %1144 = dma.done.wait [#allocation3 + $0x2], 96 }
  0x9a   :  { %1145 = vsyncadd [#allocation3 + $0x2], 4294967200 }
  0x9b   :  { %1146 = dma.done.wait [#allocation3 + $0x3], 96 }
  0x9c   :  { %1147 = vsyncadd [#allocation3 + $0x3], 4294967200 }
  0x9d   :  { %1148 = dma.done.wait [#allocation3 + $0x4], 96 }
  0x9e   :  { %1149 = vsyncadd [#allocation3 + $0x4], 4294967200 }
  0x9f   :  { %1150 = dma.done.wait [#allocation3 + $0x5], 96 }
  0xa0   :  { %1151 = vsyncadd [#allocation3 + $0x5], 4294967200 }
  0xa1   :  { %1152 = dma.done.wait [#allocation3 + $0x6], 96 }
  0xa2   :  { %1153 = vsyncadd [#allocation3 + $0x6], 4294967200 }
  0xa3   :  { %1154 = dma.done.wait [#allocation3 + $0x7], 96 }
  0xa4   :  { %1155 = vsyncadd [#allocation3 + $0x7], 4294967200  ;;  %v221_v0 = vld [vmem:[#allocation6 + $0x80] sm:$0xff]  ;;  %v222_v1 = vld [vmem:[#allocation6 + $0x88] sm:$0xff]  ;;  %s1171_s13 = smov [#allocation9]  }
  0xa5   :  { %v205_v2 = vld [vmem:[#allocation6] sm:$0xff]  ;;  %v780_v3 = vpack.c.bf16 %v222_v1, %v221_v0  ;;  %v206_v4 = vld [vmem:[#allocation6 + $0x8] sm:$0xff]  ;;  %v223_v11 = vld [vmem:[#allocation6 + $0x90] sm:$0xff]  ;;  %s525_s15 = sshll.u32 %s1171_s13, 4  ;;  %s526_s15 = int_to_ptr.vmem [resolvable:$true] %s525_s15 }
  0xa6   :  { %v253_v5 = vld [vmem:[#allocation6 + $0x180] sm:$0xff]  ;;  %v254_v6 = vld [vmem:[#allocation6 + $0x188] sm:$0xff]  ;;  %v782_v7 = vpack.c.bf16 %v206_v4, %v205_v2  ;;  %v224_v13 = vld [vmem:[#allocation6 + $0x98] sm:$0xff]  ;;  %s1114_s16 = scalar_lea.vmem %s526_s15, 128  ;;  %p1119_p11 = scmp.lt.s32.totalorder %s526_s15, %s526_s15 }
  0xa7   :  { %v812_v8 = vpack.c.bf16 %v254_v6, %v253_v5  ;;  %v237_v9 = vld [vmem:[#allocation6 + $0x100] sm:$0xff]  ;;  %v238_v10 = vld [vmem:[#allocation6 + $0x108] sm:$0xff]  ;;  %781 = vmatprep.subr.bf16.mxu0 %v780_v3  ;;  %v207_v14 = vld [vmem:[#allocation6 + $0x10] sm:$0xff]  ;;  %v784_v16 = vpack.c.bf16 %v224_v13, %v223_v11  ;;  %p1115_p1 = scmp.ne.s32.totalorder %s526_s15, %s1114_s16  ;;  %p1120_p12 = scmp.lt.s32.totalorder %s1114_s16, %s1114_s16 }
  0xa8   :  { %v814_v12 = vpack.c.bf16 %v238_v10, %v237_v9  ;;  %v208_v15 = vld [vmem:[#allocation6 + $0x18] sm:$0xff]  ;;  %783 = vmatpush3.bf16.msra.mxu0 %v782_v7  ;;  %v255_v18 = vld [vmem:[#allocation6 + $0x190] sm:$0xff]  ;;  %v225_v23 = vld [vmem:[#allocation6 + $0xa0] sm:$0xff] }
  0xa9   :  { %813 = vmatprep.subr.bf16.mxu1 %v812_v8  ;;  %v786_v17 = vpack.c.bf16 %v208_v15, %v207_v14  ;;  %v256_v19 = vld [vmem:[#allocation6 + $0x198] sm:$0xff]  ;;  %v239_v20 = vld [vmem:[#allocation6 + $0x110] sm:$0xff]  ;;  %v226_v24 = vld [vmem:[#allocation6 + $0xa8] sm:$0xff]  ;;  %785 = vmatprep.subr.bf16.mxu0 %v784_v16  ;;  %p1121_p13 = por %p1120_p12, %p1119_p11 }
  0xaa   :  { %815 = vmatpush3.bf16.msra.mxu1 %v814_v12  ;;  %v816_v21 = vpack.c.bf16 %v256_v19, %v255_v18  ;;  %v240_v22 = vld [vmem:[#allocation6 + $0x118] sm:$0xff]  ;;  %v788_v26 = vpack.c.bf16 %v226_v24, %v225_v23  ;;  %v209_v27 = vld [vmem:[#allocation6 + $0x20] sm:$0xff]  ;;  %v210_v28 = vld [vmem:[#allocation6 + $0x28] sm:$0xff] }
  0xab   :  { %v818_v25 = vpack.c.bf16 %v240_v22, %v239_v20  ;;  %v257_v29 = vld [vmem:[#allocation6 + $0x1a0] sm:$0xff]  ;;  %v258_v30 = vld [vmem:[#allocation6 + $0x1a8] sm:$0xff]  ;;  %v790_v33 = vpack.c.bf16 %v210_v28, %v209_v27  ;;  %v227_v35 = vld [vmem:[#allocation6 + $0xb0] sm:$0xff]  ;;  %p1122_p0 = pnand %p1121_p13, %p1115_p1 }
  0xac   :  { %817 = vmatprep.subr.bf16.mxu1 %v816_v21  ;;  %v241_v31 = vld [vmem:[#allocation6 + $0x120] sm:$0xff]  ;;  %v242_v32 = vld [vmem:[#allocation6 + $0x128] sm:$0xff]  ;;  %787 = vmatpush3.bf16.msra.mxu0 %v786_v17  ;;  %v820_v34 = vpack.c.bf16 %v258_v30, %v257_v29  ;;  %v228_v36 = vld [vmem:[#allocation6 + $0xb8] sm:$0xff] }
  0xad   :  { %v211_v37 = vld [vmem:[#allocation6 + $0x30] sm:$0xff]  ;;  %789 = vmatprep.subr.bf16.mxu0 %v788_v26  ;;  %v822_v38 = vpack.c.bf16 %v242_v32, %v241_v31  ;;  %v792_v39 = vpack.c.bf16 %v228_v36, %v227_v35  ;;  %v212_v40 = vld [vmem:[#allocation6 + $0x38] sm:$0xff]  ;;  %v229_v46 = vld [vmem:[#allocation6 + $0xc0] sm:$0xff] }
  0xae   :  { %819 = vmatpush3.bf16.msra.mxu1 %v818_v25  ;;  %v259_v41 = vld [vmem:[#allocation6 + $0x1b0] sm:$0xff]  ;;  %v260_v42 = vld [vmem:[#allocation6 + $0x1b8] sm:$0xff]  ;;  %v230_v47 = vld [vmem:[#allocation6 + $0xc8] sm:$0xff]  ;;  %v794_v48 = vpack.c.bf16 %v212_v40, %v211_v37 }
  0xaf   :  { %821 = vmatprep.subr.bf16.mxu1 %v820_v34  ;;  %v824_v43 = vpack.c.bf16 %v260_v42, %v259_v41  ;;  %v243_v44 = vld [vmem:[#allocation6 + $0x130] sm:$0xff]  ;;  %v244_v45 = vld [vmem:[#allocation6 + $0x138] sm:$0xff]  ;;  %v261_v49 = vld [vmem:[#allocation6 + $0x1c0] sm:$0xff]  ;;  %v796_v52 = vpack.c.bf16 %v230_v47, %v229_v46 }
  0xb0   :  { %791 = vmatpush3.bf16.msra.mxu0 %v790_v33  ;;  %v262_v50 = vld [vmem:[#allocation6 + $0x1c8] sm:$0xff]  ;;  %v826_v51 = vpack.c.bf16 %v244_v45, %v243_v44  ;;  %v213_v53 = vld [vmem:[#allocation6 + $0x40] sm:$0xff]  ;;  %v231_v58 = vld [vmem:[#allocation6 + $0xd0] sm:$0xff] }
  0xb1   :  { %793 = vmatprep.subr.bf16.mxu0 %v792_v39  ;;  %v214_v54 = vld [vmem:[#allocation6 + $0x48] sm:$0xff]  ;;  %v245_v55 = vld [vmem:[#allocation6 + $0x140] sm:$0xff]  ;;  %v828_v56 = vpack.c.bf16 %v262_v50, %v261_v49  ;;  %v232_v59 = vld [vmem:[#allocation6 + $0xd8] sm:$0xff] }
  0xb2   :  { %823 = vmatpush3.bf16.msra.mxu1 %v822_v38  ;;  %v246_v57 = vld [vmem:[#allocation6 + $0x148] sm:$0xff]  ;;  %v263_v60 = vld [vmem:[#allocation6 + $0x1d0] sm:$0xff]  ;;  %v264_v61 = vld [vmem:[#allocation6 + $0x1d8] sm:$0xff]  ;;  %v798_v62 = vpack.c.bf16 %v214_v54, %v213_v53  ;;  %v800_v0 = vpack.c.bf16 %v232_v59, %v231_v58 }
  0xb3   :  { %825 = vmatprep.subr.bf16.mxu1 %v824_v43  ;;  %v830_v63 = vpack.c.bf16 %v246_v57, %v245_v55  ;;  %v215_v1 = vld [vmem:[#allocation6 + $0x50] sm:$0xff]  ;;  %v216_v2 = vld [vmem:[#allocation6 + $0x58] sm:$0xff]  ;;  %v832_v4 = vpack.c.bf16 %v264_v61, %v263_v60  ;;  %v233_v6 = vld [vmem:[#allocation6 + $0xe0] sm:$0xff] }
  0xb4   :  { %795 = vmatpush3.bf16.msra.mxu0 %v794_v48  ;;  %v247_v3 = vld [vmem:[#allocation6 + $0x150] sm:$0xff]  ;;  %v248_v5 = vld [vmem:[#allocation6 + $0x158] sm:$0xff]  ;;  %v234_v7 = vld [vmem:[#allocation6 + $0xe8] sm:$0xff]  ;;  %v802_v10 = vpack.c.bf16 %v216_v2, %v215_v1 }
  0xb5   :  { %797 = vmatprep.subr.bf16.mxu0 %v796_v52  ;;  %v265_v8 = vld [vmem:[#allocation6 + $0x1e0] sm:$0xff]  ;;  %v266_v9 = vld [vmem:[#allocation6 + $0x1e8] sm:$0xff]  ;;  %v200_v12 = vld [vmem:[#allocation2 + $0x8] sm:$0xff]  ;;  %v834_v13 = vpack.c.bf16 %v248_v5, %v247_v3  ;;  %v804_v14 = vpack.c.bf16 %v234_v7, %v233_v6 }
  0xb6   :  { %827 = vmatpush3.bf16.msra.mxu1 %v826_v51  ;;  %v217_v11 = vld [vmem:[#allocation6 + $0x60] sm:$0xff]  ;;  %v218_v15 = vld [vmem:[#allocation6 + $0x68] sm:$0xff]  ;;  %v836_v18 = vpack.c.bf16 %v266_v9, %v265_v8  ;;  %v235_v19 = vld [vmem:[#allocation6 + $0xf0] sm:$0xff]  ;;  %372 = vmatprep.mubr.f32.mxu0 %v200_v12 }
  0xb7   :  { %829 = vmatprep.subr.bf16.mxu1 %v828_v56  ;;  %v249_v16 = vld [vmem:[#allocation6 + $0x160] sm:$0xff]  ;;  %v250_v17 = vld [vmem:[#allocation6 + $0x168] sm:$0xff]  ;;  %v236_v20 = vld [vmem:[#allocation6 + $0xf8] sm:$0xff]  ;;  %v806_v24 = vpack.c.bf16 %v218_v15, %v217_v11 }
  0xb8   :  { %799 = vmatpush3.bf16.msra.mxu0 %v798_v62  ;;  %v202_v21 = vld [vmem:[#allocation2 + $0x18] sm:$0xff]  ;;  %v267_v22 = vld [vmem:[#allocation6 + $0x1f0] sm:$0xff]  ;;  %v268_v23 = vld [vmem:[#allocation6 + $0x1f8] sm:$0xff]  ;;  %v838_v25 = vpack.c.bf16 %v250_v17, %v249_v16  ;;  %v808_v26 = vpack.c.bf16 %v236_v20, %v235_v19 }
  0xb9   :  { %801 = vmatprep.subr.bf16.mxu0 %v800_v0  ;;  %442 = vmatprep.mubr.f32.mxu1 %v202_v21  ;;  %v219_v27 = vld [vmem:[#allocation6 + $0x70] sm:$0xff]  ;;  %v220_v28 = vld [vmem:[#allocation6 + $0x78] sm:$0xff]  ;;  %v840_v30 = vpack.c.bf16 %v268_v23, %v267_v22  ;;  %v285_v32 = vld [vmem:[#allocation6 + $0x280] sm:$0xff] }
  0xba   :  { %831 = vmatpush3.bf16.msra.mxu1 %v830_v63  ;;  %v251_v29 = vld [vmem:[#allocation6 + $0x170] sm:$0xff]  ;;  %v252_v31 = vld [vmem:[#allocation6 + $0x178] sm:$0xff]  ;;  %v286_v33 = vld [vmem:[#allocation6 + $0x288] sm:$0xff]  ;;  %v810_v34 = vpack.c.bf16 %v220_v28, %v219_v27 }
  0xbb   :  { %833 = vmatprep.subr.bf16.mxu1 %v832_v4  ;;  %v842_v35 = vpack.c.bf16 %v252_v31, %v251_v29  ;;  %v844_v36 = vpack.c.bf16 %v286_v33, %v285_v32  ;;  %v269_v37 = vld [vmem:[#allocation6 + $0x200] sm:$0xff]  ;;  %v270_v38 = vld [vmem:[#allocation6 + $0x208] sm:$0xff]  ;;  %v287_v39 = vld [vmem:[#allocation6 + $0x290] sm:$0xff] }
  0xbc   :  { %803 = vmatpush3.bf16.msra.mxu0 %v802_v10  ;;  %v288_v40 = vld [vmem:[#allocation6 + $0x298] sm:$0xff]  ;;  %v199_v41 = vld [vmem:[#allocation2] sm:$0xff]  ;;  %v846_v42 = vpack.c.bf16 %v270_v38, %v269_v37  ;;  %v201_v43 = vld [vmem:[#allocation2 + $0x10] sm:$0xff] }
  0xbd   :  { %805 = vmatprep.subr.bf16.mxu0 %v804_v14  ;;  %v848_v44 = vpack.c.bf16 %v288_v40, %v287_v39  ;;  %v271_v45 = vld [vmem:[#allocation6 + $0x210] sm:$0xff]  ;;  %v272_v46 = vld [vmem:[#allocation6 + $0x218] sm:$0xff]  ;;  %v289_v47 = vld [vmem:[#allocation6 + $0x2a0] sm:$0xff] }
  0xbe   :  { %835 = vmatpush3.bf16.msra.mxu1 %v834_v13  ;;  %v290_v48 = vld [vmem:[#allocation6 + $0x2a8] sm:$0xff]  ;;  %v204_v49 = vld [vmem:[#allocation2 + $0x28] sm:$0xff]  ;;  %v850_v50 = vpack.c.bf16 %v272_v46, %v271_v45  ;;  %v273_v52 = vld [vmem:[#allocation6 + $0x220] sm:$0xff] }
  0xbf   :  { %837 = vmatprep.subr.bf16.mxu1 %v836_v18  ;;  %v852_v51 = vpack.c.bf16 %v290_v48, %v289_v47  ;;  %v274_v53 = vld [vmem:[#allocation6 + $0x228] sm:$0xff]  ;;  %v291_v54 = vld [vmem:[#allocation6 + $0x2b0] sm:$0xff]  ;;  %v292_v55 = vld [vmem:[#allocation6 + $0x2b8] sm:$0xff] }
  0xc0   :  { %807 = vmatpush3.bf16.msra.mxu0 %v806_v24  ;;  %v854_v56 = vpack.c.bf16 %v274_v53, %v273_v52  ;;  %v856_v57 = vpack.c.bf16 %v292_v55, %v291_v54  ;;  %v275_v58 = vld [vmem:[#allocation6 + $0x230] sm:$0xff]  ;;  %v276_v59 = vld [vmem:[#allocation6 + $0x238] sm:$0xff]  ;;  %v293_v60 = vld [vmem:[#allocation6 + $0x2c0] sm:$0xff] }
  0xc1   :  { %809 = vmatprep.subr.bf16.mxu0 %v808_v26  ;;  %v294_v61 = vld [vmem:[#allocation6 + $0x2c8] sm:$0xff]  ;;  %v858_v62 = vpack.c.bf16 %v276_v59, %v275_v58  ;;  %v277_v0 = vld [vmem:[#allocation6 + $0x240] sm:$0xff]  ;;  %v295_v2 = vld [vmem:[#allocation6 + $0x2d0] sm:$0xff] }
  0xc2   :  { %839 = vmatpush3.bf16.msra.mxu1 %v838_v25  ;;  %v860_v63 = vpack.c.bf16 %v294_v61, %v293_v60  ;;  %v278_v1 = vld [vmem:[#allocation6 + $0x248] sm:$0xff]  ;;  %v296_v3 = vld [vmem:[#allocation6 + $0x2d8] sm:$0xff]  ;;  %v279_v6 = vld [vmem:[#allocation6 + $0x250] sm:$0xff] }
  0xc3   :  { %841 = vmatprep.subr.bf16.mxu1 %v840_v30  ;;  %v862_v4 = vpack.c.bf16 %v278_v1, %v277_v0  ;;  %v864_v5 = vpack.c.bf16 %v296_v3, %v295_v2  ;;  %v280_v7 = vld [vmem:[#allocation6 + $0x258] sm:$0xff]  ;;  %v297_v8 = vld [vmem:[#allocation6 + $0x2e0] sm:$0xff]  ;;  %v298_v9 = vld [vmem:[#allocation6 + $0x2e8] sm:$0xff] }
  0xc4   :  { %811 = vmatpush3.bf16.msra.mxu0 %v810_v34  ;;  %v866_v10 = vpack.c.bf16 %v280_v7, %v279_v6  ;;  %v868_v11 = vpack.c.bf16 %v298_v9, %v297_v8  ;;  %v281_v12 = vld [vmem:[#allocation6 + $0x260] sm:$0xff]  ;;  %v282_v13 = vld [vmem:[#allocation6 + $0x268] sm:$0xff]  ;;  %v299_v14 = vld [vmem:[#allocation6 + $0x2f0] sm:$0xff] }
  0xc5   :  { %845 = vmatprep.subr.bf16.mxu0 %v844_v36  ;;  %v300_v15 = vld [vmem:[#allocation6 + $0x2f8] sm:$0xff]  ;;  %v870_v16 = vpack.c.bf16 %v282_v13, %v281_v12  ;;  %v283_v18 = vld [vmem:[#allocation6 + $0x270] sm:$0xff] }
  0xc6   :  { %843 = vmatpush3.bf16.msra.mxu1 %v842_v35  ;;  %v872_v17 = vpack.c.bf16 %v300_v15, %v299_v14  ;;  %v284_v19 = vld [vmem:[#allocation6 + $0x278] sm:$0xff]  ;;  %v203_v21 = vld [vmem:[#allocation2 + $0x20] sm:$0xff] }
  0xc7   :  { %373 = vmatmul.mubr.f32.vlgmr.msra.gmra.mrb[0].mxu0 %v199_v41  ;;  %v874_v20 = vpack.c.bf16 %v284_v19, %v283_v18  ;;  %v652_v23 = vld [vmem:[%s1357_s3] ss:$0 sm:$0xff] }
  0xc8   :  { %847 = vmatpush3.bf16.msra.mxu0 %v846_v42  ;;  %512 = vmatprep.mubr.f32.mxu0 %v204_v49 }
  0xc9   :  { %443 = vmatmul.mubr.f32.vlgmr.msra.gmra.mrb[0].mxu1 %v201_v43  ;;  %849 = vmatprep.subr.bf16.mxu0 %v848_v44 }
  0xcc   :  { %851 = vmatpush3.bf16.msra.mxu0 %v850_v50 }
  0xcd   :  { %853 = vmatprep.subr.bf16.mxu0 %v852_v51 }
  0xd0   :  { %855 = vmatpush3.bf16.msra.mxu0 %v854_v56 }
  0xd1   :  { %857 = vmatprep.subr.bf16.mxu0 %v856_v57 }
  0xd4   :  { %859 = vmatpush3.bf16.msra.mxu0 %v858_v62 }
  0xd5   :  { %861 = vmatprep.subr.bf16.mxu0 %v860_v63 }
  0xd8   :  { %863 = vmatpush3.bf16.msra.mxu0 %v862_v4 }
  0xd9   :  { %865 = vmatprep.subr.bf16.mxu0 %v864_v5 }
  0xdc   :  { %867 = vmatpush3.bf16.msra.mxu0 %v866_v10 }
  0xdd   :  { %869 = vmatprep.subr.bf16.mxu0 %v868_v11 }
  0xe0   :  { %871 = vmatpush3.bf16.msra.mxu0 %v870_v16 }
  0xe1   :  { %873 = vmatprep.subr.bf16.mxu0 %v872_v17 }
  0xe4   :  { %875 = vmatpush3.bf16.msra.mxu0 %v874_v20 }
  0xe7   :  { %513 = vmatmul.mubr.f32.vlgmr.msra.gmra.mrb[2].mxu0 %v203_v21 }
 0x19a   :  { %v707_v22 = vpop.f32.mrb[0].mxu0 }
 0x19b   :  { %v708_v24 = vpop.f32.mrb[1].mxu0 }
 0x19c   :  { %v742_v25 = vpop.f32.mrb[0].mxu1  ;;  %v709_v26 = vadd.f32 %v708_v24, %v707_v22 }
 0x19d   :  { %v743_v27 = vpop.f32.mrb[1].mxu1 }
 0x19e   :  { %v744_v28 = vadd.f32 %v743_v27, %v742_v25  ;;  %v375_v29 = vadd.f32 %v709_v26, %v652_v23 }
 0x1a0   :  { %v445_v30 = vadd.f32 %v744_v28, %v375_v29 }
 0x1ba   :  { %v777_v31 = vpop.f32.mrb[2].mxu0 }
 0x1bb   :  { %v778_v32 = vpop.f32.mrb[3].mxu0 }
 0x1bc   :  { %v779_v33 = vadd.f32 %v778_v32, %v777_v31 }
 0x1be   :  { %v515_v34 = vadd.f32 %v779_v33, %v445_v30 }
 0x1c0   :  { %518 = vst [vmem:[#allocation9] sm:$0xff] %v515_v34 }
 0x1c1   :  { %1125 = shalt.err (!%p1122_p0)
}
 0x1c2   :  { %s1126_s20 = scalar_lea.hbm %s1358_s4, 128 }
 0x1c3   :  { %p1127_p2 = scmp.ne.s32.totalorder %s1358_s4, %s1126_s20  ;;  %p1130_p3 = scmp.lt.u32.totalorder %s1126_s20, %s1358_s4 }
 0x1c5   :  { %p1132_p4 = pnand %p1130_p3, %p1127_p2 }
 0x1c7   :  { %1135 = shalt.err (!%p1132_p4)
}
 0x1c8   :  { %528 = dma.vmem_to_hbm [thread:$0]  %s526_s15, 128, %s1358_s4, [#allocation8]  }
 0x1c9   :  { %1156 = dma.done.wait [#allocation8], 128  }
 0x1ca   :  { %1157 = vsyncadd [#allocation8], 4294967168 }
 0x1cb   :  { %532 = vsyncpa [#allocation7], 1 }
 0x1cc   :  { %533 = vsyncpa [#allocation8], 1 }
 0x1cd   :  { %534 = vsyncmov [#allocation3] }
 0x1d0   :  { %s535_s26 = vpop.sfrf %534 }
 0x1d1   :  { %p653_p5 = scmp.ne.s32.totalorder %s535_s26, 0 }
 0x1d3   :  { %539 = shalt.err (%p653_p5)  }
 0x1d4   :  { %541 = vsyncmov [#allocation3 + $0x1] }
 0x1d7   :  { %s542_s28 = vpop.sfrf %541 }
 0x1d8   :  { %p654_p6 = scmp.ne.s32.totalorder %s542_s28, 0 }
 0x1da   :  { %546 = shalt.err (%p654_p6)  }
 0x1db   :  { %548 = vsyncmov [#allocation3 + $0x2] }
 0x1de   :  { %s549_s29 = vpop.sfrf %548 }
 0x1df   :  { %p655_p7 = scmp.ne.s32.totalorder %s549_s29, 0 }
 0x1e1   :  { %553 = shalt.err (%p655_p7)  }
 0x1e2   :  { %555 = vsyncmov [#allocation3 + $0x3] }
 0x1e5   :  { %s556_s30 = vpop.sfrf %555 }
 0x1e6   :  { %p656_p8 = scmp.ne.s32.totalorder %s556_s30, 0 }
 0x1e8   :  { %560 = shalt.err (%p656_p8)  }
 0x1e9   :  { %562 = vsyncmov [#allocation3 + $0x4] }
 0x1ec   :  { %s563_s4 = vpop.sfrf %562 }
 0x1ed   :  { %p657_p9 = scmp.ne.s32.totalorder %s563_s4, 0 }
 0x1ef   :  { %567 = shalt.err (%p657_p9)  }
 0x1f0   :  { %569 = vsyncmov [#allocation3 + $0x5] }
 0x1f3   :  { %s570_s1 = vpop.sfrf %569 }
 0x1f4   :  { %p658_p10 = scmp.ne.s32.totalorder %s570_s1, 0 }
 0x1f6   :  { %574 = shalt.err (%p658_p10)  }
 0x1f7   :  { %576 = vsyncmov [#allocation3 + $0x6] }
 0x1fa   :  { %s577_s17 = vpop.sfrf %576 }
 0x1fb   :  { %p659_p1 = scmp.ne.s32.totalorder %s577_s17, 0 }
 0x1fd   :  { %581 = shalt.err (%p659_p1)  }
 0x1fe   :  { %583 = vsyncmov [#allocation3 + $0x7] }
 0x201   :  { %s584_s19 = vpop.sfrf %583 }
 0x202   :  { %p660_p11 = scmp.ne.s32.totalorder %s584_s19, 0 }
 0x204   :  { %588 = shalt.err (%p660_p11)  }

</bundles_post_ra>
